<compile_context>
chip_gen: v7x
topology: tpu7x:2x2x1
jax: 0.10.0
libtpu: 0.0.40
codegen_flags: <defaults>
</compile_context>

<pallas_src>
import functools

import jax
import jax.numpy as jnp
from jax.experimental import pallas as pl
from jax.experimental.pallas import tpu as pltpu


def _round_up(n: int, m: int) -> int:
    return ((n + m - 1) // m) * m


def _self_attention_kernel(x_ref, wq_ref, wkv_ref, o_ref, *, tq, d_pad, seq_real, scale):
    i = pl.program_id(0)

    x_full = x_ref[...]            # (seq_pad, d_in_pad)
    s_pad = x_full.shape[0]

    # Fused K|V projection for all rows: one MXU matmul with N = 2*d_pad lanes.
    kv = jnp.dot(x_full, wkv_ref[...], preferred_element_type=jnp.float32)   # (seq_pad, 2*d_pad)
    k = kv[:, :d_pad]
    v = kv[:, d_pad:]

    # Q projection for this query tile only.
    row0 = pl.multiple_of(i * tq, tq)
    x_q = x_ref[pl.ds(row0, tq), :]                                          # (tq, d_in_pad)
    q = jnp.dot(x_q, wq_ref[...], preferred_element_type=jnp.float32)        # (tq, d_pad)

    # scores = Q @ K^T without materializing a transpose: contract on last dims.
    scores = jax.lax.dot_general(
        q, k, (((1,), (1,)), ((), ())), preferred_element_type=jnp.float32)  # (tq, seq_pad)
    scores = scores * jnp.float32(scale)

    # Mask zero-padded key rows so padding never leaks into the softmax.
    key_idx = jax.lax.broadcasted_iota(jnp.int32, (tq, s_pad), 1)
    scores = jnp.where(key_idx < seq_real, scores, jnp.float32(-1e30))

    # Numerically-stable softmax over keys; EUP reciprocal + one Newton step.
    scores = scores - jnp.max(scores, axis=-1, keepdims=True)
    p = jnp.exp(scores)
    denom = jnp.sum(p, axis=-1, keepdims=True)
    inv = pl.reciprocal(denom, approx=True)
    inv = inv * (2.0 - denom * inv)   # one Newton refinement -> ~f32-exact 1/denom
    p = p * inv

    # context = attn_weights @ V
    o_ref[...] = jnp.dot(p, v, preferred_element_type=jnp.float32).astype(o_ref.dtype)


def self_attention_v2(x, w_query, w_key, w_value, *, tq=None, compute_dtype=None):
    """Forward pass of SelfAttention_v2.

    x:       [seq, d_in] float32
    w_*:     PyTorch nn.Linear weights (bias=False), shape [d_out, d_in]
    tq:      query-row tile size (multiple of 8). Default: one tile if seq < 128.
    compute_dtype: optionally jnp.bfloat16 to feed the MXU in bf16 on v6e/v7x
                   (accumulation & softmax stay f32).
    """
    seq, d_in = x.shape
    d_out = w_query.shape[0]

    # Lane-dense padded sizes.
    d_pad = _round_up(d_out, 128)
    d_in_pad = _round_up(d_in, 128)

    if tq is None:
        tq = 128 if seq >= 128 else _round_up(seq, 8)
    tq = max(8, _round_up(tq, 8))
    seq_pad = _round_up(seq, tq)

    # Pre-transpose nn.Linear weights ([d_out, d_in] -> [d_in, d_out]) and zero-pad.
    def prep(w):
        wt = jnp.asarray(w).T
        return jnp.pad(wt, ((0, d_in_pad - d_in), (0, d_pad - d_out)))

    w_q = prep(w_query)                                              # [d_in_pad, d_pad]
    w_kv = jnp.concatenate([prep(w_key), prep(w_value)], axis=1)     # [d_in_pad, 2*d_pad]
    x_pad = jnp.pad(x, ((0, seq_pad - seq), (0, d_in_pad - d_in)))   # [seq_pad, d_in_pad]

    if compute_dtype is not None:
        x_pad = x_pad.astype(compute_dtype)
        w_q = w_q.astype(compute_dtype)
        w_kv = w_kv.astype(compute_dtype)

    scale = 1.0 / (d_out ** 0.5)   # matches torch: scores / keys.shape[-1]**0.5

    kernel = functools.partial(
        _self_attention_kernel, tq=tq, d_pad=d_pad, seq_real=seq, scale=scale)

    out_pad = pl.pallas_call(
        kernel,
        out_shape=jax.ShapeDtypeStruct((seq_pad, d_pad), jnp.float32),
        grid_spec=pltpu.PrefetchScalarGridSpec(
            num_scalar_prefetch=0,
            grid=(seq_pad // tq,),
            in_specs=[
                pl.BlockSpec((seq_pad, d_in_pad), lambda i: (0, 0)),   # x, resident
                pl.BlockSpec((d_in_pad, d_pad), lambda i: (0, 0)),     # W_q
                pl.BlockSpec((d_in_pad, 2 * d_pad), lambda i: (0, 0)), # W_k | W_v fused
            ],
            out_specs=pl.BlockSpec((tq, d_pad), lambda i: (i, 0)),
        ),
        compiler_params=pltpu.CompilerParams(
            dimension_semantics=("parallel",),   # query tiles shard across TCs on v7x
        ),
    )(x_pad, w_q, w_kv)

    return out_pad[:seq, :d_out].astype(x.dtype)


def _reference(x, w_query, w_key, w_value):
    q = x @ w_query.T
    k = x @ w_key.T
    v = x @ w_value.T
    w = jax.nn.softmax((q @ k.T) / (k.shape[-1] ** 0.5), axis=-1)
    return w @ v


if __name__ == "__main__":
    # Small shapes consistent with the module's surrounding script: d_in=3, d_out=2.
    # seq=22 with tq=8 exercises a multi-tile grid (3 q-tiles) plus seq/d padding.
    seq, d_in, d_out = 22, 3, 2

    key = jax.random.PRNGKey(0)
    kx, kq, kk, kv = jax.random.split(key, 4)

    x = jax.random.uniform(kx, (seq, d_in), dtype=jnp.float32)
    # Deterministic "nn.Linear(d_in, d_out, bias=False)" weights, shape [d_out, d_in].
    bound = 1.0 / (d_in ** 0.5)
    w_query = jax.random.uniform(kq, (d_out, d_in), minval=-bound, maxval=bound, dtype=jnp.float32)
    w_key = jax.random.uniform(kk, (d_out, d_in), minval=-bound, maxval=bound, dtype=jnp.float32)
    w_value = jax.random.uniform(kv, (d_out, d_in), minval=-bound, maxval=bound, dtype=jnp.float32)

    out = self_attention_v2(x, w_query, w_key, w_value, tq=8)
    out = jax.block_until_ready(out)

    ref = _reference(x, w_query, w_key, w_value)
    assert out.shape == (seq, d_out)
    assert jnp.allclose(out, ref, atol=2e-5, rtol=2e-5), "mismatch vs pure-JAX reference"

    print("KERNEL_OK")
</pallas_src>

<mosaic_0001>
module attributes {stable_mosaic.version = 11 : i64} {
  func.func @_self_attention_kernel(%arg0: i32, %arg1: memref<24x128xf32, #tpu.memory_space<vmem>>, %arg2: memref<128x128xf32, #tpu.memory_space<vmem>>, %arg3: memref<128x256xf32, #tpu.memory_space<vmem>>, %arg4: memref<8x128xf32, #tpu.memory_space<vmem>>) attributes {dimension_semantics = [#tpu.dimension_semantics<parallel>], iteration_bounds = array<i64: 3>, scalar_prefetch = 0 : i64, scratch_operands = 0 : i64, tpu.core_type = #tpu.core_type<tc>, window_params = [{pipeline_mode = #tpu.pipeline_mode<synchronous>, transform_indices = @transform_0, window_bounds = array<i64: 24, 128>}, {pipeline_mode = #tpu.pipeline_mode<synchronous>, transform_indices = @transform_1, window_bounds = array<i64: 128, 128>}, {pipeline_mode = #tpu.pipeline_mode<synchronous>, transform_indices = @transform_2, window_bounds = array<i64: 128, 256>}, {transform_indices = @transform_3, window_bounds = array<i64: 8, 128>}]} {
    %c0 = arith.constant 0 : index
    %c0_0 = arith.constant 0 : index
    %0 = vector.load %arg1[%c0, %c0_0] : memref<24x128xf32, #tpu.memory_space<vmem>>, vector<24x128xf32>
    %c0_1 = arith.constant 0 : index
    %c0_2 = arith.constant 0 : index
    %1 = vector.load %arg3[%c0_1, %c0_2] : memref<128x256xf32, #tpu.memory_space<vmem>>, vector<128x256xf32>
    %cst = arith.constant dense<0.000000e+00> : vector<24x256xf32>
    %2 = tpu.matmul %0, %1, %cst {dimension_numbers = #tpu.dot_dimension_numbers<[1], [0], [0], [1], [0, 0, 1, 1], [], []>} : vector<24x128xf32>, vector<128x256xf32>, vector<24x256xf32> -> vector<24x256xf32>
    %3 = vector.extract_strided_slice %2 {offsets = [0, 0], sizes = [24, 128], strides = [1, 1]} : vector<24x256xf32> to vector<24x128xf32>
    %4 = vector.extract_strided_slice %2 {offsets = [0, 128], sizes = [24, 128], strides = [1, 1]} : vector<24x256xf32> to vector<24x128xf32>
    %c8_i32 = arith.constant 8 : i32
    %5 = arith.muli %arg0, %c8_i32 : i32
    %6 = tpu.assume_multiple %5, 8 : i32
    %7 = arith.index_cast %6 : i32 to index
    %c0_3 = arith.constant 0 : index
    %8 = vector.load %arg1[%7, %c0_3] : memref<24x128xf32, #tpu.memory_space<vmem>>, vector<8x128xf32>
    %c0_4 = arith.constant 0 : index
    %c0_5 = arith.constant 0 : index
    %9 = vector.load %arg2[%c0_4, %c0_5] : memref<128x128xf32, #tpu.memory_space<vmem>>, vector<128x128xf32>
    %cst_6 = arith.constant dense<0.000000e+00> : vector<8x128xf32>
    %10 = tpu.matmul %8, %9, %cst_6 {dimension_numbers = #tpu.dot_dimension_numbers<[1], [0], [0], [1], [0, 0, 1, 1], [], []>} : vector<8x128xf32>, vector<128x128xf32>, vector<8x128xf32> -> vector<8x128xf32>
    %cst_7 = arith.constant dense<0.000000e+00> : vector<8x24xf32>
    %11 = tpu.matmul %10, %3, %cst_7 {dimension_numbers = #tpu.dot_dimension_numbers<[1], [1], [0], [0], [0, 0, 1, 0], [], []>} : vector<8x128xf32>, vector<24x128xf32>, vector<8x24xf32> -> vector<8x24xf32>
    %cst_8 = arith.constant 0.707106769 : f32
    %12 = vector.broadcast %cst_8 : f32 to vector<8x24xf32>
    %13 = arith.mulf %11, %12 : vector<8x24xf32>
    %14 = tpu.iota {dimensions = array<i32: 1>} : vector<8x24xi32>
    %c22_i32 = arith.constant 22 : i32
    %15 = vector.broadcast %c22_i32 : i32 to vector<8x24xi32>
    %16 = arith.cmpi slt, %14, %15 : vector<8x24xi32>
    %cst_9 = arith.constant -1.000000e+30 : f32
    %17 = vector.broadcast %cst_9 : f32 to vector<8x24xf32>
    %18 = arith.select %16, %13, %17 : vector<8x24xi1>, vector<8x24xf32>
    %cst_10 = arith.constant dense<0xFF800000> : vector<8xf32>
    %19 = vector.multi_reduction <maximumf>, %18, %cst_10 [1] : vector<8x24xf32> to vector<8xf32>
    %20 = vector.shape_cast %19 : vector<8xf32> to vector<8x1xf32>
    %21 = vector.broadcast %20 : vector<8x1xf32> to vector<8x24xf32>
    %22 = arith.subf %18, %21 : vector<8x24xf32>
    %23 = math.exp %22 : vector<8x24xf32>
    %cst_11 = arith.constant dense<0.000000e+00> : vector<8xf32>
    %24 = vector.multi_reduction <add>, %23, %cst_11 [1] : vector<8x24xf32> to vector<8xf32>
    %25 = vector.shape_cast %24 : vector<8xf32> to vector<8x1xf32>
    %26 = tpu.reciprocal %25 {approx = true} : vector<8x1xf32> -> vector<8x1xf32>
    %27 = arith.mulf %25, %26 : vector<8x1xf32>
    %cst_12 = arith.constant 2.000000e+00 : f32
    %28 = vector.broadcast %cst_12 : f32 to vector<8x1xf32>
    %29 = arith.subf %28, %27 : vector<8x1xf32>
    %30 = arith.mulf %26, %29 : vector<8x1xf32>
    %31 = vector.broadcast %30 : vector<8x1xf32> to vector<8x24xf32>
    %32 = arith.mulf %23, %31 : vector<8x24xf32>
    %cst_13 = arith.constant dense<0.000000e+00> : vector<8x128xf32>
    %33 = tpu.matmul %32, %4, %cst_13 {dimension_numbers = #tpu.dot_dimension_numbers<[1], [0], [0], [1], [0, 0, 1, 1], [], []>} : vector<8x24xf32>, vector<24x128xf32>, vector<8x128xf32> -> vector<8x128xf32>
    %c0_14 = arith.constant 0 : index
    %c0_15 = arith.constant 0 : index
    %34 = vector.load %arg4[%c0_14, %c0_15] : memref<8x128xf32, #tpu.memory_space<vmem>>, vector<8x128xf32>
    tpu.vector_store %arg4[%c0_14, %c0_15], %33 {strides = array<i32>} : memref<8x128xf32, #tpu.memory_space<vmem>>, vector<8x128xf32>,
    return
  }
  func.func @transform_0(%arg0: i32) -> (i32, i32) {
    %c0_i32 = arith.constant 0 : i32
    %c0_i32_0 = arith.constant 0 : i32
    %c0_i32_1 = arith.constant 0 : i32
    return %c0_i32, %c0_i32_0 : i32, i32
  }
  func.func @transform_1(%arg0: i32) -> (i32, i32) {
    %c0_i32 = arith.constant 0 : i32
    %c0_i32_0 = arith.constant 0 : i32
    %c0_i32_1 = arith.constant 0 : i32
    return %c0_i32, %c0_i32_0 : i32, i32
  }
  func.func @transform_2(%arg0: i32) -> (i32, i32) {
    %c0_i32 = arith.constant 0 : i32
    %c0_i32_0 = arith.constant 0 : i32
    %c0_i32_1 = arith.constant 0 : i32
    return %c0_i32, %c0_i32_0 : i32, i32
  }
  func.func @transform_3(%arg0: i32) -> (i32, i32) {
    %c0_i32 = arith.constant 0 : i32
    %c0_i32_0 = arith.constant 0 : i32
    return %arg0, %c0_i32 : i32, i32
  }
}

</mosaic_0001>

<bundles_post_ra>
// kernel: tpu_custom_call.1
= control target key start
LH: loop header
LB: loop body
LE: loop exit
PB: predicated region body
PF: predicated region fallthrough
CT: control target
= control target key end

     0   :  { %8 = vsyncpa [#allocation3], 0  ;;  %s1302_s0 = inlined_call_operand.hbm [shape: f32[24,128], index: 0, kind: input, shape index: {}]   ;;  %s1303_s1 = inlined_call_operand.hbm [shape: f32[128,128], index: 1, kind: input, shape index: {}]   ;;  %s1304_s2 = inlined_call_operand.hbm [shape: f32[128,256], index: 2, kind: input, shape index: {}]   ;;  %s1305_s3 = inlined_call_operand.hbm [shape: f32[24,128], index: 3, kind: output, shape index: {}]  }
   0x1   :  { %9 = vsyncpa [#allocation6], 0 }
   0x2   :  { %10 = vsyncpa [#allocation4], 0 }
   0x3   :  { %12 = vsyncpa [#allocation4 + $0x1], 0  ;;  %s1082_s12 = smov 0   ;;  %s1084_s13 = smov 0  }
   0x4   :  { %s1086_s14 = smov 0   ;;  %s1088_s15 = smov 0  }
   0x5 LB: > { %s1103_s16 = sadd.s32 4294967295, %s1049_s15   ;;  %s658_s17 = sadd.s32 4294967294, %s1049_s15   ;;  %s1049_s15 = sphi %s1088_s15, %s1324_s15   ;;  %s1045_s14 = sphi %s1086_s14, %s1323_s14   ;;  %s1041_s13 = sphi %s1084_s13, %s1322_s13   ;;  %s1037_s12 = sphi %s1082_s12, %s1321_s12  }
   0x6   : > { %s1107_s18 = sadd.s32 1, %s1049_s15   ;;  %s88_s19 = sadd.s32 1, %s1045_s14 }
   0x7   : > { %s85_s20 = ssub.s32 %s1049_s15, %s1107_s18  ;;  %p98_p0 = scmp.ne.s32.totalorder %s1045_s14, %s1041_s13 }
   0x8   : > { %p86_p1 = scmp.eq.s32.totalorder %s85_s20, 0  ;;  %p99_p2 = scmp.eq.s32.totalorder %s1103_s16, 2 }
   0x9   : > { %p104_p3 = scmp.ne.s32.totalorder %s1041_s13, %s1037_s12  ;;  %p105_p4 = scmp.eq.s32.totalorder %s658_s17, 2 }
   0xa   : > { %s1118_s21 = scalar_select %p86_p1, %s1045_s14, %s88_s19  }
   0xb   : > { %p1120_p5 = por %p99_p2, %p98_p0  ;;  %p1124_p6 = por %p105_p4, %p104_p3 }
   0xc   : > { %p659_p7 = scmp.ge.s32.totalorder %s1049_s15, 1  ;;  %p112_p8 = scmp.lt.s32.totalorder %s1049_s15, 4 }
   0xd   : > { %s1309_s22 = scalar_select %p1120_p5, 1, 0 }
   0xe   : > { %s1310_s23 = scalar_select %p1124_p6, 1, 0 }
   0xf   : > { %p1306_p9 = scmp.eq.s32.totalorder %s1103_s16, 0  ;;  %p1131_p10 = pnand %p659_p7, %p112_p8 }
  0x10   : > { %s1051_s25 = smov [#allocation5]   ;;  %s1052_s28 = smov [#allocation2]  }
  0x11   : > { %s1311_s24 = scalar_select %p1131_p10, 1, 0 }
  0x12   : > { %p828_p11 = pneg %p1131_p10  ;;  %s137_s26 = sshll.u32 %s1051_s25, 4  ;;  %s1137_s26 = int_to_ptr.vmem [resolvable:$true] %s137_s26 }
  0x13   : > { %s124_s29 = sshll.u32 %s1052_s28, 4  ;;  %s1053_s30 = smov [#allocation7]   ;;  %s1145_s29 = int_to_ptr.vmem [resolvable:$true] %s124_s29 }
  0x14   : > { %p1141_p12 = pnand %p1306_p9, %p828_p11  ;;  %s1147_s4 = sshll.u32 %s1053_s30, 4  ;;  %s151_s4 = int_to_ptr.vmem [resolvable:$true] %s1147_s4 }
  0x15   : > { %s895_s7 = scalar_lea.hbm %s1303_s1, 2048 }
  0x16   : > { %p896_p13 = scmp.ne.s32.totalorder %s1303_s1, %s895_s7  ;;  %p1157_p0 = pneg %p1141_p12 }
  0x17   : > { %p902_p3 = scmp.lt.u32.totalorder %s895_s7, %s1303_s1 }
  0x18   : > { %p898_p1 = pnand %p1157_p0, %p896_p13 }
  0x1a   : > { %p899_p2 = pneg %p898_p1 }
  0x1c   : > { %p904_p4 = pnand %p902_p3, %p899_p2 }
  0x1e   : > { %907 = shalt.err (!%p904_p4)
}
  0x1f   : > { %s908_s19 = scalar_lea.vmem %s1137_s26, 2048  ;;  %p916_p9 = scmp.lt.s32.totalorder %s1137_s26, %s1137_s26 }
  0x20   : > { %p909_p7 = scmp.ne.s32.totalorder %s1137_s26, %s908_s19  ;;  %p917_p6 = scmp.lt.s32.totalorder %s908_s19, %s908_s19 }
  0x22   : > { %p911_p8 = pnand %p909_p7, %p1157_p0  ;;  %p918_p13 = por %p917_p6, %p916_p9 }
  0x24   : > { %p912_p11 = pneg %p911_p8 }
  0x26   : > { %p919_p1 = pnand %p918_p13, %p912_p11 }
  0x28   : > { %922 = shalt.err (!%p919_p1)
}
  0x29   : > { %s1054_s20 = smov 128   ;;  %s1055_s25 = smov 8  }
  0x2a   : > { %834 = dma.hbm_to_vmem [thread:$0]  (!%p1141_p12), %s1303_s1, 2048, %s1137_s26, [#allocation6], %s1054_s20, %s1054_s20, %s1055_s25  }
  0x2b   : > { %s923_s7 = scalar_lea.hbm %s1302_s0, 384 }
  0x2c   : > { %p924_p6 = scmp.ne.s32.totalorder %s1302_s0, %s923_s7  ;;  %p930_p3 = scmp.lt.u32.totalorder %s923_s7, %s1302_s0 }
  0x2e   : > { %p926_p9 = pnand %p924_p6, %p1157_p0 }
  0x30   : > { %p927_p2 = pneg %p926_p9 }
  0x32   : > { %p932_p4 = pnand %p930_p3, %p927_p2 }
  0x34   : > { %935 = shalt.err (!%p932_p4)
}
  0x35   : > { %s936_s26 = scalar_lea.vmem %s1145_s29, 384  ;;  %p944_p13 = scmp.lt.s32.totalorder %s1145_s29, %s1145_s29 }
  0x36   : > { %p937_p7 = scmp.ne.s32.totalorder %s1145_s29, %s936_s26  ;;  %p945_p1 = scmp.lt.s32.totalorder %s936_s26, %s936_s26 }
  0x38   : > { %p939_p8 = pnand %p937_p7, %p1157_p0  ;;  %p946_p6 = por %p945_p1, %p944_p13 }
  0x3a   : > { %p940_p11 = pneg %p939_p8 }
  0x3c   : > { %p947_p9 = pnand %p946_p6, %p940_p11 }
  0x3e   : > { %950 = shalt.err (!%p947_p9)
}
  0x3f   : > { %831 = dma.hbm_to_vmem [thread:$0]  (!%p1141_p12), %s1302_s0, 384, %s1145_s29, [#allocation3], %s1054_s20, %s1054_s20, %s1055_s25  }
  0x40   : > { %s951_s6 = scalar_lea.hbm %s1304_s2, 4096 }
  0x41   : > { %p952_p2 = scmp.ne.s32.totalorder %s1304_s2, %s951_s6  ;;  %p958_p7 = scmp.lt.u32.totalorder %s951_s6, %s1304_s2 }
  0x43   : > { %p954_p3 = pnand %p952_p2, %p1157_p0 }
  0x45   : > { %p955_p4 = pneg %p954_p3 }
  0x47   : > { %p960_p8 = pnand %p958_p7, %p955_p4 }
  0x49   : > { %963 = shalt.err (!%p960_p8)
}
  0x4a   : > { %s964_s17 = scalar_lea.vmem %s151_s4, 4096  ;;  %p972_p6 = scmp.lt.s32.totalorder %s151_s4, %s151_s4 }
  0x4b   : > { %p965_p11 = scmp.ne.s32.totalorder %s151_s4, %s964_s17  ;;  %p973_p9 = scmp.lt.s32.totalorder %s964_s17, %s964_s17 }
  0x4d   : > { %p967_p13 = pnand %p965_p11, %p1157_p0  ;;  %p974_p5 = por %p973_p9, %p972_p6 }
  0x4f   : > { %p968_p1 = pneg %p967_p13 }
  0x51   : > { %p975_p10 = pnand %p974_p5, %p968_p1 }
  0x53   : > { %978 = shalt.err (!%p975_p10)
}
  0x54   : > { %s1056_s29 = smov 256   ;;  %s1057_s20 = smov 16  }
  0x55   : > { %837 = dma.hbm_to_vmem [thread:$0]  (!%p1141_p12), %s1304_s2, 4096, %s151_s4, [#allocation6], %s1056_s29, %s1056_s29, %s1057_s20  }
  0x56   : > { %p1314_p2 = scmp.ne.s32.totalorder %s1311_s24, 0 }
  0x57   : > { %p1315_p3 = scmp.eq.s32.totalorder (!%p1314_p2), %s1103_s16, 0 }
  0x58   : > { %166 = sbr.rel (%p1314_p2) target bundleno = 1126 (0x466), region = 32 }
  0x5f   : > { %1024 = dma.done.wait (%p1315_p3), [#allocation3], 384   ;;  %p1316_p0 = pmov %p1315_p3 }
  0x61   : > { %1026 = vsyncadd (%p1316_p0), [#allocation3], 4294966912  ;;  %p1317_p5 = pmov %p1316_p0 }
  0x62   : > { %p1318_p10 = pmov %p1316_p0 }
  0x63   : > { %1028 = dma.done.wait (%p1317_p5), [#allocation6], 6144  }
  0x64   : > { %1030 = vsyncadd (%p1318_p10), [#allocation6], 4294961152  ;;  %v1058_v0 = vmov 0.0|0.0   ;;  %v1059_v1 = vmov 0.0   ;;  %vm1060_vm0 = vmmov 0   ;;  %v197_v2 = vld [vmem:[#allocation7 + $0x8] sm:$0xff] }
  0x65   : > { %784 = vmatprep.subr.bf16.mxu1 %v1058_v0  ;;  %292 = vmatprep.mubr.f32.mxu0 %v1059_v1  ;;  %v199_v3 = vld [vmem:[#allocation7 + $0x18] sm:$0xff]  ;;  %v196_v4 = vld [vmem:[#allocation7] sm:$0xff]  ;;  %v198_v6 = vld [vmem:[#allocation7 + $0x10] sm:$0xff]  ;;  %s668_s24 = sshll.u32 %s1103_s16, 3  ;;  %vm475_vm2 = vcmask 195584   ;;  %s190_s4 = sand.u32 1, %s1041_s13  }
  0x66   : > { %731 = vmatprep.mubr.msk.f32.mxu1 %vm1060_vm0, %v1059_v1  ;;  %v752_v5 = vpack.c.bf16 %v199_v3, %v197_v2  ;;  %v201_v7 = vld [vmem:[#allocation7 + $0x28] sm:$0xff]  ;;  %v203_v8 = vld [vmem:[#allocation7 + $0x38] sm:$0xff]  ;;  %v754_v9 = vpack.c.bf16 %v198_v6, %v196_v4  ;;  %v200_v11 = vld [vmem:[#allocation7 + $0x20] sm:$0xff]  ;;  %s312_s27 = scalar_lea.vmem [#allocation2], %s668_s24  ;;  %s667_s10 = sshll.u32 %s190_s4, 3 }
  0x67   : > { %v756_v10 = vpack.c.bf16 %v203_v8, %v201_v7  ;;  %v202_v12 = vld [vmem:[#allocation7 + $0x30] sm:$0xff]  ;;  %v205_v13 = vld [vmem:[#allocation7 + $0x48] sm:$0xff]  ;;  %v207_v14 = vld [vmem:[#allocation7 + $0x58] sm:$0xff]  ;;  %s192_s19 = scalar_lea.vmem [#allocation8], %s667_s10  ;;  %s671_s30 = sshll.u32 %s1103_s16, 7 }
  0x68   : > { %753 = vmatprep.subr.bf16.mxu0 %v752_v5  ;;  %v758_v15 = vpack.c.bf16 %v202_v12, %v200_v11  ;;  %v760_v16 = vpack.c.bf16 %v207_v14, %v205_v13  ;;  %v204_v17 = vld [vmem:[#allocation7 + $0x40] sm:$0xff]  ;;  %v206_v18 = vld [vmem:[#allocation7 + $0x50] sm:$0xff]  ;;  %v209_v19 = vld [vmem:[#allocation7 + $0x68] sm:$0xff]  ;;  %s578_s28 = sshll.u32 %s192_s19, 4  ;;  %s1262_s7 = scalar_lea.hbm %s1305_s3, %s671_s30  ;;  %s1257_s28 = int_to_ptr.vmem [resolvable:$true] %s578_s28 }
  0x69   : > { %755 = vmatpush1.bf16.msra.mxu0 %v754_v9  ;;  %v211_v20 = vld [vmem:[#allocation7 + $0x78] sm:$0xff]  ;;  %v314_v21 = vld [vmem:[#allocation5] sm:$0xff]  ;;  %v315_v22 = vld [vmem:[#allocation5 + $0x8] sm:$0xff]  ;;  %v762_v23 = vpack.c.bf16 %v206_v18, %v204_v17  ;;  %s565_s8 = scalar_lea.sflag [#allocation4], %s190_s4  ;;  %s979_s9 = scalar_lea.vmem %s1257_s28, 128 }
  0x6a   : > { %757 = vmatprep.subr.bf16.mxu0 %v756_v10  ;;  %v785_v24 = vpack.c.bf16 %v315_v22, %v314_v21  ;;  %v316_v25 = vld [vmem:[#allocation5 + $0x10] sm:$0xff]  ;;  %v764_v26 = vpack.c.bf16 %v211_v20, %v209_v19  ;;  %v208_v27 = vld [vmem:[#allocation7 + $0x60] sm:$0xff]  ;;  %v317_v29 = vld [vmem:[#allocation5 + $0x18] sm:$0xff]  ;;  %p980_p12 = scmp.ne.s32.totalorder %s1257_s28, %s979_s9  ;;  %p1319_p4 = scmp.ne.s32.totalorder %s1309_s22, 0 }
  0x6b   : > { %v210_v28 = vld [vmem:[#allocation7 + $0x70] sm:$0xff]  ;;  %v213_v30 = vld [vmem:[#allocation7 + $0x88] sm:$0xff]  ;;  %v215_v31 = vld [vmem:[#allocation7 + $0x98] sm:$0xff]  ;;  %v788_v32 = vpack.c.bf16 %v317_v29, %v316_v25  ;;  %v471_v25 = vlaneseq  ;;  %s1061_s16 = smov [#allocation8]  }
  0x6c   : > { %786 = vmatpush3.bf16.msra.mxu1 %v785_v24  ;;  %v318_v33 = vld [vmem:[#allocation5 + $0x20] sm:$0xff]  ;;  %v319_v34 = vld [vmem:[#allocation5 + $0x28] sm:$0xff]  ;;  %v766_v35 = vpack.c.bf16 %v210_v28, %v208_v27  ;;  %v768_v36 = vpack.c.bf16 %v215_v31, %v213_v30  ;;  %v214_v38 = vld [vmem:[#allocation7 + $0x90] sm:$0xff]  ;;  %p981_p7 = pnand %p980_p12, %p1319_p4  ;;  %s983_s11 = sshll.u32 %s1061_s16, 4  ;;  %s984_s11 = int_to_ptr.vmem [resolvable:$false] %s983_s11 }
  0x6d   : > { %759 = vmatpush1.bf16.msra.mxu0 %v758_v15  ;;  %787 = vmatprep.subr.bf16.mxu1 %v1058_v0  ;;  %v212_v37 = vld [vmem:[#allocation7 + $0x80] sm:$0xff]  ;;  %v217_v39 = vld [vmem:[#allocation7 + $0xa8] sm:$0xff]  ;;  %v219_v40 = vld [vmem:[#allocation7 + $0xb8] sm:$0xff]  ;;  %v791_v41 = vpack.c.bf16 %v319_v34, %v318_v33  ;;  %s985_s17 = scalar_lea.vmem %s984_s11, 256  ;;  %p986_p11 = scmp.lt.s32.totalorder %s1257_s28, %s984_s11 }
  0x6e   : > { %761 = vmatprep.subr.bf16.mxu0 %v760_v16  ;;  %v320_v42 = vld [vmem:[#allocation5 + $0x30] sm:$0xff]  ;;  %v321_v43 = vld [vmem:[#allocation5 + $0x38] sm:$0xff]  ;;  %v770_v44 = vpack.c.bf16 %v214_v38, %v212_v37  ;;  %v772_v45 = vpack.c.bf16 %v219_v40, %v217_v39  ;;  %v216_v46 = vld [vmem:[#allocation7 + $0xa0] sm:$0xff]  ;;  %p982_p8 = pneg %p981_p7  ;;  %p987_p13 = scmp.lt.s32.totalorder %s985_s17, %s979_s9 }
  0x6f   : > { %v218_v47 = vld [vmem:[#allocation7 + $0xb0] sm:$0xff]  ;;  %v221_v48 = vld [vmem:[#allocation7 + $0xc8] sm:$0xff]  ;;  %v223_v49 = vld [vmem:[#allocation7 + $0xd8] sm:$0xff]  ;;  %v794_v50 = vpack.c.bf16 %v321_v43, %v320_v42 }
  0x70   : > { %789 = vmatpush3.bf16.msra.mxu1 %v788_v32  ;;  %v322_v51 = vld [vmem:[#allocation5 + $0x40] sm:$0xff]  ;;  %v323_v52 = vld [vmem:[#allocation5 + $0x48] sm:$0xff]  ;;  %v774_v53 = vpack.c.bf16 %v218_v47, %v216_v46  ;;  %v776_v54 = vpack.c.bf16 %v223_v49, %v221_v48  ;;  %v222_v56 = vld [vmem:[#allocation7 + $0xd0] sm:$0xff]  ;;  %p988_p1 = por %p987_p13, %p986_p11 }
  0x71   : > { %763 = vmatpush1.bf16.msra.mxu0 %v762_v23  ;;  %790 = vmatprep.subr.bf16.mxu1 %v1058_v0  ;;  %v220_v55 = vld [vmem:[#allocation7 + $0xc0] sm:$0xff]  ;;  %v225_v57 = vld [vmem:[#allocation7 + $0xe8] sm:$0xff]  ;;  %v227_v58 = vld [vmem:[#allocation7 + $0xf8] sm:$0xff]  ;;  %v797_v59 = vpack.c.bf16 %v323_v52, %v322_v51 }
  0x72   : > { %765 = vmatprep.subr.bf16.mxu0 %v764_v26  ;;  %v324_v60 = vld [vmem:[#allocation5 + $0x50] sm:$0xff]  ;;  %v325_v61 = vld [vmem:[#allocation5 + $0x58] sm:$0xff]  ;;  %v778_v62 = vpack.c.bf16 %v222_v56, %v220_v55  ;;  %v780_v63 = vpack.c.bf16 %v227_v58, %v225_v57  ;;  %v224_v2 = vld [vmem:[#allocation7 + $0xe0] sm:$0xff]  ;;  %v472_v26 = vand.u32 127, %v471_v25  ;;  %p989_p6 = pnand %p988_p1, %p982_p8 }
  0x73   : > { %v226_v3 = vld [vmem:[#allocation7 + $0xf0] sm:$0xff]  ;;  %v800_v4 = vpack.c.bf16 %v325_v61, %v324_v60  ;;  %v326_v5 = vld [vmem:[#allocation5 + $0x60] sm:$0xff]  ;;  %v327_v6 = vld [vmem:[#allocation5 + $0x68] sm:$0xff] }
  0x74   : > { %792 = vmatpush3.bf16.msra.mxu1 %v791_v41  ;;  %v782_v7 = vpack.c.bf16 %v226_v3, %v224_v2  ;;  %v803_v8 = vpack.c.bf16 %v327_v6, %v326_v5  ;;  %v328_v9 = vld [vmem:[#allocation5 + $0x70] sm:$0xff]  ;;  %v329_v10 = vld [vmem:[#allocation5 + $0x78] sm:$0xff]  ;;  %v193_v11 = vld [vmem:[#allocation2] sm:$0xff]  ;;  %vm473_vm1 = vcmp.lt.s32.totalorder %v472_v26, 22 }
  0x75   : > { %767 = vmatpush1.bf16.msra.mxu0 %v766_v35  ;;  %793 = vmatprep.subr.bf16.mxu1 %v1058_v0  ;;  %v806_v12 = vpack.c.bf16 %v329_v10, %v328_v9  ;;  %v194_v13 = vld [vmem:[#allocation2 + $0x8] sm:$0xff]  ;;  %v313_v14 = vld [vmem:[%s312_s27] sm:$0xff]  ;;  %v195_v15 = vld [vmem:[#allocation2 + $0x10] sm:$0xff] }
  0x76   : > { %769 = vmatprep.subr.bf16.mxu0 %v768_v36 }
  0x78   : > { %795 = vmatpush3.bf16.msra.mxu1 %v794_v50 }
  0x79   : > { %771 = vmatpush1.bf16.msra.mxu0 %v770_v44  ;;  %796 = vmatprep.subr.bf16.mxu1 %v1058_v0 }
  0x7a   : > { %773 = vmatprep.subr.bf16.mxu0 %v772_v45 }
  0x7c   : > { %798 = vmatpush3.bf16.msra.mxu1 %v797_v59 }
  0x7d   : > { %775 = vmatpush1.bf16.msra.mxu0 %v774_v53  ;;  %799 = vmatprep.subr.bf16.mxu1 %v1058_v0 }
  0x7e   : > { %777 = vmatprep.subr.bf16.mxu0 %v776_v54 }
  0x80   : > { %801 = vmatpush3.bf16.msra.mxu1 %v800_v4 }
  0x81   : > { %779 = vmatpush1.bf16.msra.mxu0 %v778_v62  ;;  %802 = vmatprep.subr.bf16.mxu1 %v1058_v0 }
  0x82   : > { %781 = vmatprep.subr.bf16.mxu0 %v780_v63 }
  0x84   : > { %804 = vmatpush3.bf16.msra.mxu1 %v803_v8 }
  0x85   : > { %783 = vmatpush1.bf16.msra.mxu0 %v782_v7  ;;  %805 = vmatprep.subr.bf16.mxu1 %v1058_v0 }
  0x86   : > { %808 = vmatprep.subr.bf16.mxu0 %v1058_v0 }
  0x88   : > { %293 = vmatmul.mubr.f32.vlgmr.msra.gmra.mrb[0].mxu0 %v193_v11  ;;  %807 = vmatpush3.bf16.msra.mxu1 %v806_v12 }
  0x89   : > { %298 = vmatprep.mubr.f32.mxu0 %v1059_v1  ;;  %811 = vmatprep.subr.bf16.mxu1 %v1058_v0 }
  0x8b   : > { %732 = vmatmul.mubr.f32.vlgmr.msra.gmra.mrb[0].mxu1 %v313_v14 }
  0x8c   : > { %299 = vmatmul.mubr.f32.gmra.mrb[2].mxu0 %v194_v13  ;;  %749 = vmatprep.mubr.msk.f32.mxu1 %vm1060_vm0, %v1059_v1 }
  0x8d   : > { %304 = vmatprep.mubr.f32.mxu0 %v1059_v1 }
  0x90   : > { %305 = vmatmul.mubr.f32.gmra.mrb[4].mxu0 %v195_v15 }
  0x91   : > { %740 = vmatprep.mubr.msk.f32.mxu0 %vm1060_vm0, %v1059_v1 }
 0x15b   : > { %v294_v16 = vpop.f32.mrb[0].mxu0 }
 0x15c   : > { %v296_v17 = vpop.f32.mrb[1].mxu0 }
 0x15e   : > { %v396_v22 = vpop.f32.mrb[0].mxu1 }
 0x15f   : > { %v300_v18 = vpop.f32.mrb[2].mxu0  ;;  %v733_v0 = vpop.f32.mrb[1].mxu1 }
 0x160   : > { %v809_v19 = vpack.c.bf16 %v300_v18, %v294_v16  ;;  %v302_v20 = vpop.f32.mrb[3].mxu0 }
 0x161   : > { %v812_v21 = vpack.c.bf16 %v302_v20, %v296_v17 }
 0x162   : > { %810 = vmatpush3.bf16.xpose.msra.mxu0 %v809_v19 }
 0x163   : > { %813 = vmatpush3.bf16.msra.mxu1 %v812_v21  ;;  %v306_v23 = vpop.f32.mrb[4].mxu0  ;;  %738 = vmatprep.subr.mxu0 %v1059_v1 }
 0x164   : > { %v308_v24 = vpop.f32.mrb[5].mxu0  ;;  %747 = vmatprep.subr.mxu1 %v1059_v1 }
 0x167   : > { %748 = vmatpush3.msra.mxu1 %v308_v24 }
 0x16a   : > { %739 = vmatpush3.xpose.msra.mxu0 %v306_v23 }
 0x16d   : > { %741 = vmatmul.mubr.f32.vlgmr.msra.gmra.mrb[6].mxu0 %v396_v22 }
 0x240   : > { %v466_v27 = vpop.f32.mrb[6].mxu0 }
 0x241   : > { %v470_v28 = vmul.f32 0.70710677, %v466_v27  ;;  %v742_v29 = vpop.f32.mrb[7].mxu0 }
 0x243   : > { %v474_v30 = vsel %vm473_vm1, %v470_v28, -1e+30 }
 0x244   : > { %v476_v31 = vsel %vm475_vm2, %v474_v30, -inf }
 0x245   : > { %477 = vmax.xlane.f32.xlu0 %v476_v31 }
 0x2d2   : > { %v478_v32 = vpop.xlane.xlu0 %477 }
 0x2d3   : > { %v479_v33 = vsub.f32 %v474_v30, %v478_v32 }
 0x2d5   : > { %v480_v34 = vmul.f32 1.442695, %v479_v33 }
 0x2d7   : > { %891 = vpow2.f32 %v480_v34 }
 0x2e1   : > { %v892_v1 = vpop.eup %891 }
 0x2e2   : > { %v482_v35 = vsel %vm475_vm2, %v892_v1, 0.0 }
 0x2e3   : > { %483 = vadd.xlane.f32.xlu0 %v482_v35 }
 0x370   : > { %v484_v36 = vpop.xlane.xlu0 %483 }
 0x371   : > { %893 = vrcp.f32 %v484_v36 }
 0x37b   : > { %v894_v37 = vpop.eup %893 }
 0x37c   : > { %v486_v38 = vmul.f32 %v894_v37, %v484_v36 }
 0x37e   : > { %v487_v39 = vsub.f32 2.0, %v486_v38 }
 0x380   : > { %v488_v40 = vmul.f32 %v894_v37, %v487_v39 }
 0x382   : > { %v489_v41 = vmul.f32 %v892_v1, %v488_v40 }
 0x384   : > { %750 = vmatmul.mubr.msk.f32.vlgmr.msra.gmra.mrb[2].mxu1 %vm475_vm2, %v489_v41 }
 0x457   : > { %v559_v42 = vpop.f32.mrb[2].mxu1 }
 0x458   : > { %563 = vst [vmem:[%s192_s19] sm:$0xff] %v559_v42  ;;  %v751_v43 = vpop.f32.mrb[3].mxu1 }
 0x459   : > { %992 = shalt.err (!%p989_p6)
}
 0x45a   : > { %s993_s29 = scalar_lea.hbm %s1262_s7, 128  ;;  %s997_s26 = scalar_lea.hbm %s1305_s3, 384 }
 0x45b   : > { %p994_p9 = scmp.ne.s32.totalorder %s1262_s7, %s993_s29  ;;  %p998_p0 = scmp.lt.u32.totalorder %s1262_s7, %s1305_s3 }
 0x45c   : > { %p999_p5 = scmp.lt.u32.totalorder %s997_s26, %s993_s29  ;;  %p1001_p12 = scmp.lt.u32.totalorder %s993_s29, %s1262_s7 }
 0x45d   : > { %p995_p2 = pnand %p994_p9, %p1319_p4 }
 0x45e   : > { %p1000_p10 = por %p999_p5, %p998_p0 }
 0x45f   : > { %p996_p3 = pneg %p995_p2 }
 0x460   : > { %p1002_p7 = por %p1001_p12, %p1000_p10 }
 0x462   : > { %p1003_p8 = pnand %p1002_p7, %p996_p3 }
 0x464   : > { %1006 = shalt.err (!%p1003_p8)
}
 0x465   : > { %826 = dma.vmem_to_hbm [thread:$0]  (%p1319_p4), %s1257_s28, 128, %s1262_s7, %s565_s8  }
 0x466 PF: > { %p848_p11 = scmp.ge.s32.totalorder %s1049_s15, 2  ;;  %s590_s4 = sand.u32 1, %s1037_s12  }
 0x467   : > { %p1320_p13 = scmp.ne.s32.totalorder %s1310_s23, 0  ;;  %s591_s10 = scalar_lea.sflag [#allocation4], %s590_s4 }
 0x469   : > { %p839_p1 = pnand %p848_p11, %p1320_p13 }
 0x46b   : > { %1032 = dma.done.wait (!%p839_p1), %s591_s10, 128  }
 0x46c   : > { %1034 = vsyncadd (!%p839_p1), %s591_s10, 4294967168  ;;  %p15_p6 = scmp.ge.s32.totalorder %s1107_s18, 5   ;;  %s1321_s12 = smov %s1041_s13 }
 0x46d   : > { %s1322_s13 = smov %s1045_s14  ;;  %s1323_s14 = smov %s1118_s21 }
 0x46e   : > { %s1324_s15 = smov %s1107_s18  ;;  %17 = sbr.rel (!%p15_p6) target bundleno = 5 (0x5), region = 78 }
 0x475   :  { %596 = vsyncpa [#allocation3], 1 }
 0x476   :  { %598 = vsyncpa [#allocation3 + $0x1], 1 }
 0x477   :  { %599 = vsyncpa [#allocation6], 1 }
 0x478   :  { %600 = vsyncpa [#allocation4], 1 }
 0x479   :  { %602 = vsyncpa [#allocation4 + $0x1], 1 }

</bundles_post_ra>
